<compile_context>
chip_gen: v6e
topology: v6e:2x2x1
jax: 0.10.0
libtpu: 0.0.40
codegen_flags: <defaults>
</compile_context>

<pallas_src>
from functools import partial

import jax
import jax.numpy as jnp
from jax.experimental import pallas as pl
from jax.experimental.pallas import tpu as pltpu


def _row_chunks(n_rows, max_chunks=4, align=8):
    """Split [0, n_rows) into <= max_chunks contiguous, 8-row-aligned chunks."""
    n_rows = int(n_rows)
    if n_rows <= 0:
        return ((0, 0),)
    n_chunks = max(1, min(max_chunks, pl.cdiv(n_rows, align)))
    per = pl.cdiv(n_rows, n_chunks)
    per = ((per + align - 1) // align) * align  # keep chunk starts 8-aligned
    chunks = []
    start = 0
    while start < n_rows:
        size = min(per, n_rows - start)
        chunks.append((start, size))
        start += size
    return tuple(chunks)


def _hbm_copy_kernel(x_hbm, o_hbm, sem, *, chunks):
    """Identity copy via a few overlapping HBM->HBM DMAs (no VMEM staging)."""
    n_rows = x_hbm.shape[0]
    copies = []
    for idx, (start, size) in enumerate(chunks):
        if len(chunks) == 1 and start == 0 and size == n_rows:
            src, dst = x_hbm, o_hbm                       # whole-array copy
        else:
            src = x_hbm.at[pl.ds(start, size)]            # row-contiguous slab
            dst = o_hbm.at[pl.ds(start, size)]
        cp = pltpu.make_async_copy(src, dst, sem.at[idx])
        cp.start()                                        # issue all DMAs ...
        copies.append(cp)
    for cp in copies:                                     # ... then wait on all
        cp.wait()


@partial(jax.jit, static_argnums=(1,))
def _hbm_identity_copy(flat, chunks):
    n_chunks = len(chunks)
    return pl.pallas_call(
        partial(_hbm_copy_kernel, chunks=chunks),
        out_shape=jax.ShapeDtypeStruct(flat.shape, flat.dtype),
        in_specs=[pl.BlockSpec(memory_space=pl.ANY)],     # raw HBM ref (no auto-DMA)
        out_specs=pl.BlockSpec(memory_space=pl.ANY),      # raw HBM ref
        scratch_shapes=[pltpu.SemaphoreType.DMA((n_chunks,))],
    )(flat)


def ray_point_embedding_forward(rays, render_kwargs=None, *, force_copy=False):
    """JAX/Pallas equivalent of RayPointEmbedding.forward.

    rays: (B, ...) array. Returns {'rays': rays reshaped to (B, -1)}.

    IdentityEmbedding children are no-ops, so the wait_iters/stop_iters gating
    has no numerical effect and is not traced.  By default (force_copy=False)
    this is a metadata-only reshape with zero HBM traffic; force_copy=True
    keeps an explicit kernel boundary and materializes the flattened copy via
    a few large HBM->HBM DMAs.
    """
    del render_kwargs
    batch = rays.shape[0]
    flat = rays.reshape(batch, -1)  # metadata-only, matches torch .view(B, -1)

    if not force_copy:
        # Optimal path: identity + flatten needs no kernel and no HBM traffic.
        return {"rays": flat}

    chunks = _row_chunks(flat.shape[0])
    return {"rays": _hbm_identity_copy(flat, chunks)}


if __name__ == "__main__":
    key = jax.random.PRNGKey(0)

    # Small ray batch: 2 rays, 8 points per ray, 16 channels -> flat (2, 128).
    B, N, C = 2, 8, 16
    rays = jax.random.normal(key, (B, N, C), dtype=jnp.float32)
    expected = rays.reshape(B, -1)

    out = jax.block_until_ready(
        ray_point_embedding_forward(rays, {}, force_copy=True)["rays"])
    assert out.shape == (B, N * C), out.shape
    assert out.dtype == rays.dtype
    assert bool(jnp.all(out == expected)), "Pallas output mismatch vs reference"

    # Larger batch exercises the multi-chunk (4 overlapping DMAs) path.
    raysL = jax.random.normal(jax.random.PRNGKey(1), (64, N, C), dtype=jnp.float32)
    outL = jax.block_until_ready(
        ray_point_embedding_forward(raysL, {}, force_copy=True)["rays"])
    assert outL.shape == (64, N * C)
    assert bool(jnp.all(outL == raysL.reshape(64, -1)))

    # Non-(8,128)-aligned shape: DMA copies arbitrary full-row slabs fine.
    rays2 = jax.random.normal(jax.random.PRNGKey(2), (4, 5, 6), dtype=jnp.float32)
    out2 = jax.block_until_ready(
        ray_point_embedding_forward(rays2, {}, force_copy=True)["rays"])
    assert out2.shape == (4, 30)
    assert bool(jnp.all(out2 == rays2.reshape(4, -1)))

    # Default zero-copy fast path (no pallas_call) agrees as well.
    out3 = ray_point_embedding_forward(rays, {})["rays"]
    assert bool(jnp.all(out3 == expected))

    print("KERNEL_OK")
</pallas_src>

<mosaic_0001>
module attributes {stable_mosaic.version = 11 : i64} {
  func.func @_hbm_copy_kernel(%arg0: memref<2x128xf32, #tpu.memory_space<any>>, %arg1: memref<2x128xf32, #tpu.memory_space<any>>, %arg2: memref<1x!tpu.dma_semaphore, #tpu.memory_space<semaphore_mem>>) attributes {dimension_semantics = [], scalar_prefetch = 0 : i64, scratch_operands = 1 : i64, tpu.core_type = #tpu.core_type<tc>} {
    %c0_i32 = arith.constant 0 : i32
    %0 = tpu.memref_slice %arg2[%c0_i32] : memref<1x!tpu.dma_semaphore, #tpu.memory_space<semaphore_mem>> -> memref<1x!tpu.dma_semaphore, #tpu.memory_space<semaphore_mem>>
    %1 = tpu.memref_squeeze %0 : memref<1x!tpu.dma_semaphore, #tpu.memory_space<semaphore_mem>> -> memref<!tpu.dma_semaphore, #tpu.memory_space<semaphore_mem>>
    tpu.enqueue_dma source(%arg0 : memref<2x128xf32, #tpu.memory_space<any>>) target(%arg1 : memref<2x128xf32, #tpu.memory_space<any>>) target_semaphore(%1 : memref<!tpu.dma_semaphore, #tpu.memory_space<semaphore_mem>>)
    %c0_i32_0 = arith.constant 0 : i32
    %2 = tpu.memref_slice %arg2[%c0_i32_0] : memref<1x!tpu.dma_semaphore, #tpu.memory_space<semaphore_mem>> -> memref<1x!tpu.dma_semaphore, #tpu.memory_space<semaphore_mem>>
    %3 = tpu.memref_squeeze %2 : memref<1x!tpu.dma_semaphore, #tpu.memory_space<semaphore_mem>> -> memref<!tpu.dma_semaphore, #tpu.memory_space<semaphore_mem>>
    tpu.wait_dma2 semaphore(%3 : memref<!tpu.dma_semaphore, #tpu.memory_space<semaphore_mem>>) src(%arg0 : memref<2x128xf32, #tpu.memory_space<any>>) dst(%arg1 : memref<2x128xf32, #tpu.memory_space<any>>)
    return
  }
}

</mosaic_0001>

<bundles_post_ra>
// kernel: _hbm_identity_copy.1
= control target key start
LH: loop header
LB: loop body
LE: loop exit
PB: predicated region body
PF: predicated region fallthrough
CT: control target
= control target key end

     0   :  { %s28_s6 = smov [#allocation2]   ;;  %s29_s7 = smov 131072   ;;  %s47_s0 = inlined_call_operand.hbm [shape: f32[2,128], index: 0, kind: input, shape index: {}]   ;;  %s48_s1 = inlined_call_operand.hbm [shape: f32[2,128], index: 1, kind: output, shape index: {}]  }
   0x1   :  { %s30_s8 = smov 0  }
   0x2   :  { %12 = dma.general %s47_s0, 32, %s48_s1, %s28_s6, %s29_s7, [#allocation4], %s30_s8, 0  }
   0x3   :  { %26 = dma.done.wait [#allocation2], 32 }
   0x4   :  { %27 = vsyncadd [#allocation2], 4294967264 }
   0x5   :  { %16 = vsyncmov [#allocation2] }
   0x8   :  { %s17_s13 = vpop.sfrf %16 }
   0x9   :  { %p22_p0 = scmp.ne.s32.totalorder %s17_s13, 0 }
   0xb   :  { %21 = shalt.err (%p22_p0)  }

</bundles_post_ra>
